<compile_context>
chip_gen: v5e
topology: v5e:2x2
jax: 0.10.0
libtpu: 0.0.40
codegen_flags: <defaults>
</compile_context>

<pallas_src>
import jax
import jax.numpy as jnp
from jax import lax
from jax.experimental import pallas as pl
from jax.experimental.pallas import tpu as pltpu


# ---------------------------------------------------------------------------
# Phase 1: H = (X * out_deg^{-1/2}) @ W   (also emit H^T for the NT matmul)
# ---------------------------------------------------------------------------
def h_kernel(x_ref, nsrc_ref, w_ref, h_ref, ht_ref):
    xn = (x_ref[...] * nsrc_ref[...]).astype(jnp.bfloat16)           # (TM, Fin)
    h = jnp.dot(xn, w_ref[...], preferred_element_type=jnp.float32)  # (TM, Fout) f32 acc
    h_ref[...] = h.astype(jnp.bfloat16)
    # transpose once here (amortized over all phase-2 row tiles)
    ht_ref[...] = jnp.transpose(h).astype(jnp.bfloat16)              # (Fout, TM)


# ---------------------------------------------------------------------------
# Phase 2 (per dst-row tile): edge scores, masked edge softmax, copy_u+sum,
# destination normalization + bias.
# ---------------------------------------------------------------------------
def agg_kernel(a_ref, h_ref, ht_ref, ndst_ref, b_ref, rst_ref, esoft_ref):
    tm = a_ref.shape[0]
    i = pl.program_id(0)

    A = a_ref[...]                                   # (TM, N)   bf16 0/1
    H = h_ref[...]                                   # (N, Fout) bf16 (resident)
    Ht = ht_ref[...]                                 # (Fout, N) bf16 (resident)

    # dst-row slice of H for this tile (aligned dynamic slice of resident H)
    row0 = pl.multiple_of(i * tm, tm)
    Hd = h_ref[pl.ds(row0, tm), :]                   # (TM, Fout) bf16
    T = jnp.tanh(Hd.astype(jnp.float32)).astype(jnp.bfloat16)

    # edge scores E[dst, src] = sum_d tanh(H_dst[d]) * H_src[d]   (MXU, bf16->f32)
    E = jnp.dot(T, Ht, preferred_element_type=jnp.float32)          # (TM, N)
    E = jnp.where(E >= 0.0, E, 0.2 * E)              # leaky_relu(0.2)

    # masked edge softmax over incoming edges of each dst row
    E_m = jnp.where(A > 0, E, -1e30)
    row_max = jnp.max(E_m, axis=1, keepdims=True)
    row_max = jnp.where(row_max <= -1e29, 0.0, row_max)   # rows with no edges
    ex = jnp.exp(E_m - row_max)                      # masked entries underflow to 0
    denom = jnp.maximum(jnp.sum(ex, axis=1, keepdims=True), 1e-30)
    esoft_ref[...] = ex * pl.reciprocal(denom, approx=True)

    # message passing: rst[i] = sum_{j in N(i)} H[j]  ==  A @ H   (MXU, bf16->f32)
    rst = jnp.dot(A, H, preferred_element_type=jnp.float32)         # (TM, Fout)
    rst_ref[...] = rst * ndst_ref[...] + b_ref[...]


# ---------------------------------------------------------------------------
# Wrapper
# ---------------------------------------------------------------------------
def graph_conv(A, X, W, bias, *, tm=128):
    N, Fin = X.shape
    Fout = W.shape[1]
    tm = min(tm, N)
    assert N % tm == 0, "N must be a multiple of the row tile"

    # Degree norms are trivial O(N^2) reductions — precomputing them here
    # avoids any in-kernel NxN transpose of A.
    deg_out = jnp.maximum(jnp.sum(A, axis=0), 1.0)            # out-degree of src j
    deg_in = jnp.maximum(jnp.sum(A, axis=1), 1.0)             # in-degree of dst i
    n_src = lax.rsqrt(deg_out).reshape(N, 1).astype(jnp.float32)
    n_dst = lax.rsqrt(deg_in).reshape(N, 1).astype(jnp.float32)

    A16 = A.astype(jnp.bfloat16)                              # 0/1 exact in bf16
    W16 = W.astype(jnp.bfloat16)
    bias2d = bias.reshape(1, Fout).astype(jnp.float32)

    cp = pltpu.CompilerParams(
        dimension_semantics=("parallel",),     # shards row tiles across TCs on v7x
        vmem_limit_bytes=48 * 1024 * 1024,     # above 16/32 MiB scoped defaults,
                                               # below v7x 64 MiB physical
    )
    grid = (N // tm,)

    # Phase 1: H and H^T
    h, ht = pl.pallas_call(
        h_kernel,
        out_shape=(
            jax.ShapeDtypeStruct((N, Fout), jnp.bfloat16),
            jax.ShapeDtypeStruct((Fout, N), jnp.bfloat16),
        ),
        grid=grid,
        in_specs=[
            pl.BlockSpec((tm, Fin), lambda i: (i, 0)),
            pl.BlockSpec((tm, 1), lambda i: (i, 0)),
            pl.BlockSpec((Fin, Fout), lambda i: (0, 0)),      # grid-invariant
        ],
        out_specs=(
            pl.BlockSpec((tm, Fout), lambda i: (i, 0)),
            pl.BlockSpec((Fout, tm), lambda i: (0, i)),
        ),
        compiler_params=cp,
    )(X, n_src, W16)

    # Phase 2: edge softmax + aggregation, tiled over destination rows.
    # (For very large graphs, the grid-invariant H/H^T inputs could additionally
    # use pipeline_mode=pl.Buffered(1) to skip double-buffering them.)
    rst, e_soft = pl.pallas_call(
        agg_kernel,
        out_shape=(
            jax.ShapeDtypeStruct((N, Fout), jnp.float32),     # rst
            jax.ShapeDtypeStruct((N, N), jnp.float32),        # e_soft (dense)
        ),
        grid=grid,
        in_specs=[
            pl.BlockSpec((tm, N), lambda i: (i, 0)),          # A row tile (streams)
            pl.BlockSpec((N, Fout), lambda i: (0, 0)),        # H   (resident)
            pl.BlockSpec((Fout, N), lambda i: (0, 0)),        # H^T (resident)
            pl.BlockSpec((tm, 1), lambda i: (i, 0)),          # n_dst tile
            pl.BlockSpec((1, Fout), lambda i: (0, 0)),        # bias
        ],
        out_specs=(
            pl.BlockSpec((tm, Fout), lambda i: (i, 0)),
            pl.BlockSpec((tm, N), lambda i: (i, 0)),
        ),
        compiler_params=cp,
    )(A16, h, ht, n_dst, bias2d)

    return rst, e_soft


# ---------------------------------------------------------------------------
# Plain-JAX reference mirroring the PyTorch/DGL forward
# ---------------------------------------------------------------------------
def graph_conv_ref(A, X, W, bias):
    hp = jax.lax.Precision.HIGHEST
    deg_out = jnp.maximum(A.sum(axis=0), 1.0)
    Xn = X * (deg_out ** -0.5)[:, None]
    H = jnp.dot(Xn, W, precision=hp)
    E = jnp.dot(jnp.tanh(H), H.T, precision=hp)
    E = jnp.where(E >= 0.0, E, 0.2 * E)
    mask = A > 0
    E_m = jnp.where(mask, E, -jnp.inf)
    row_max = jnp.max(E_m, axis=1, keepdims=True)
    row_max = jnp.where(jnp.isfinite(row_max), row_max, 0.0)
    ex = jnp.where(mask, jnp.exp(E - row_max), 0.0)
    denom = jnp.maximum(ex.sum(axis=1, keepdims=True), 1e-30)
    e_soft = ex / denom
    rst = jnp.dot(A, H, precision=hp)
    deg_in = jnp.maximum(A.sum(axis=1), 1.0)
    rst = rst * (deg_in ** -0.5)[:, None] + bias[None, :]
    return rst, e_soft


if __name__ == "__main__":
    N, Fin, Fout = 256, 128, 128      # small, tile-aligned; exercises a 2-tile grid

    key = jax.random.PRNGKey(0)
    k_adj, k_feat, k_w = jax.random.split(key, 3)

    # random directed graph + self-loops (as recommended in the module docstring)
    A = (jax.random.uniform(k_adj, (N, N)) < 0.1).astype(jnp.float32)
    A = jnp.maximum(A, jnp.eye(N, dtype=jnp.float32))

    X = jax.random.normal(k_feat, (N, Fin), dtype=jnp.float32)

    # Glorot/Xavier uniform weight, zero bias (as in reset_parameters)
    bound = (6.0 / (Fin + Fout)) ** 0.5
    W = jax.random.uniform(k_w, (Fin, Fout), jnp.float32, -bound, bound)
    bias = jnp.zeros((Fout,), jnp.float32)

    rst, e_soft = graph_conv(A, X, W, bias, tm=128)
    jax.block_until_ready((rst, e_soft))

    rst_ref, e_soft_ref = graph_conv_ref(A, X, W, bias)
    assert rst.shape == (N, Fout) and e_soft.shape == (N, N)
    assert jnp.allclose(rst, rst_ref, rtol=2e-2, atol=2e-2), \
        float(jnp.max(jnp.abs(rst - rst_ref)))
    assert jnp.allclose(e_soft, e_soft_ref, rtol=2e-2, atol=2e-2), \
        float(jnp.max(jnp.abs(e_soft - e_soft_ref)))

    print("KERNEL_OK")
</pallas_src>

<mosaic_0001>
module attributes {stable_mosaic.version = 11 : i64} {
  func.func @h_kernel(%arg0: i32, %arg1: memref<128x128xf32, #tpu.memory_space<vmem>>, %arg2: memref<128x1xf32, #tpu.memory_space<vmem>>, %arg3: memref<128x128xbf16, #tpu.memory_space<vmem>>, %arg4: memref<128x128xbf16, #tpu.memory_space<vmem>>, %arg5: memref<128x128xbf16, #tpu.memory_space<vmem>>) attributes {dimension_semantics = [#tpu.dimension_semantics<parallel>], iteration_bounds = array<i64: 2>, scalar_prefetch = 0 : i64, scratch_operands = 0 : i64, tpu.core_type = #tpu.core_type<tc>, window_params = [{transform_indices = @transform_0, window_bounds = array<i64: 128, 128>}, {transform_indices = @transform_1, window_bounds = array<i64: 128, 1>}, {pipeline_mode = #tpu.pipeline_mode<synchronous>, transform_indices = @transform_2, window_bounds = array<i64: 128, 128>}, {transform_indices = @transform_3, window_bounds = array<i64: 128, 128>}, {transform_indices = @transform_4, window_bounds = array<i64: 128, 128>}]} {
    %c0 = arith.constant 0 : index
    %c0_0 = arith.constant 0 : index
    %0 = vector.load %arg1[%c0, %c0_0] : memref<128x128xf32, #tpu.memory_space<vmem>>, vector<128x128xf32>
    %c0_1 = arith.constant 0 : index
    %c0_2 = arith.constant 0 : index
    %1 = vector.load %arg2[%c0_1, %c0_2] : memref<128x1xf32, #tpu.memory_space<vmem>>, vector<128x1xf32>
    %2 = vector.broadcast %1 : vector<128x1xf32> to vector<128x128xf32>
    %3 = arith.mulf %0, %2 : vector<128x128xf32>
    %4 = arith.truncf %3 : vector<128x128xf32> to vector<128x128xbf16>
    %c0_3 = arith.constant 0 : index
    %c0_4 = arith.constant 0 : index
    %5 = vector.load %arg3[%c0_3, %c0_4] : memref<128x128xbf16, #tpu.memory_space<vmem>>, vector<128x128xbf16>
    %cst = arith.constant dense<0.000000e+00> : vector<128x128xf32>
    %6 = tpu.matmul %4, %5, %cst {dimension_numbers = #tpu.dot_dimension_numbers<[1], [0], [0], [1], [0, 0, 1, 1], [], []>} : vector<128x128xbf16>, vector<128x128xbf16>, vector<128x128xf32> -> vector<128x128xf32>
    %7 = arith.truncf %6 : vector<128x128xf32> to vector<128x128xbf16>
    %c0_5 = arith.constant 0 : index
    %c0_6 = arith.constant 0 : index
    %8 = vector.load %arg4[%c0_5, %c0_6] : memref<128x128xbf16, #tpu.memory_space<vmem>>, vector<128x128xbf16>
    tpu.vector_store %arg4[%c0_5, %c0_6], %7 {strides = array<i32>} : memref<128x128xbf16, #tpu.memory_space<vmem>>, vector<128x128xbf16>,
    %9 = tpu.transpose %6, [1, 0] : vector<128x128xf32> -> vector<128x128xf32>
    %10 = arith.truncf %9 : vector<128x128xf32> to vector<128x128xbf16>
    %c0_7 = arith.constant 0 : index
    %c0_8 = arith.constant 0 : index
    %11 = vector.load %arg5[%c0_7, %c0_8] : memref<128x128xbf16, #tpu.memory_space<vmem>>, vector<128x128xbf16>
    tpu.vector_store %arg5[%c0_7, %c0_8], %10 {strides = array<i32>} : memref<128x128xbf16, #tpu.memory_space<vmem>>, vector<128x128xbf16>,
    return
  }
  func.func @transform_0(%arg0: i32) -> (i32, i32) {
    %c0_i32 = arith.constant 0 : i32
    %c0_i32_0 = arith.constant 0 : i32
    return %arg0, %c0_i32 : i32, i32
  }
  func.func @transform_1(%arg0: i32) -> (i32, i32) {
    %c0_i32 = arith.constant 0 : i32
    %c0_i32_0 = arith.constant 0 : i32
    return %arg0, %c0_i32 : i32, i32
  }
  func.func @transform_2(%arg0: i32) -> (i32, i32) {
    %c0_i32 = arith.constant 0 : i32
    %c0_i32_0 = arith.constant 0 : i32
    %c0_i32_1 = arith.constant 0 : i32
    return %c0_i32, %c0_i32_0 : i32, i32
  }
  func.func @transform_3(%arg0: i32) -> (i32, i32) {
    %c0_i32 = arith.constant 0 : i32
    %c0_i32_0 = arith.constant 0 : i32
    return %arg0, %c0_i32 : i32, i32
  }
  func.func @transform_4(%arg0: i32) -> (i32, i32) {
    %c0_i32 = arith.constant 0 : i32
    %c0_i32_0 = arith.constant 0 : i32
    return %c0_i32, %arg0 : i32, i32
  }
}

</mosaic_0001>

<bundles_post_ra>
// kernel: tpu_custom_call.1
= control target key start
LH: loop header
LB: loop body
LE: loop exit
PB: predicated region body
PF: predicated region fallthrough
CT: control target
= control target key end

     0   :  { %10 = vsyncpa [#allocation3], 0  ;;  %s1344_s0 = inlined_call_operand.vmem [shape: f32[256,128], index: 0, kind: input, shape index: {}]   ;;  %s1345_s1 = inlined_call_operand.vmem [shape: f32[256,1], index: 1, kind: input, shape index: {}]   ;;  %s1346_s2 = inlined_call_operand.hbm [shape: bf16[128,128], index: 2, kind: input, shape index: {}]   ;;  %s1347_s3 = inlined_call_operand.hbm [shape: bf16[256,128], index: 3, kind: output, shape index: {0}]   ;;  %s1348_s4 = inlined_call_operand.hbm [shape: bf16[128,256], index: 4, kind: output, shape index: {1}]  }
   0x1   :  { %11 = vsyncpa [#allocation4], 0 }
   0x2   :  { %13 = vsyncpa [#allocation4 + $0x1], 0 }
   0x3   :  { %14 = vsyncpa [#allocation7], 0 }
   0x4   :  { %16 = vsyncpa [#allocation7 + $0x1], 0  ;;  %s1154_s15 = smov 0   ;;  %s1156_s16 = smov 0  }
   0x5   :  { %s1158_s17 = smov 0   ;;  %s1160_s18 = smov 0  }
   0x6 LB: > { %s1175_s19 = sadd.s32 4294967295, %s1120_s18   ;;  %s750_s20 = sadd.s32 4294967294, %s1120_s18   ;;  %s1120_s18 = sphi %s1160_s18, %s1354_s18   ;;  %s1116_s17 = sphi %s1158_s17, %s1353_s17   ;;  %s1112_s16 = sphi %s1156_s16, %s1352_s16   ;;  %s1108_s15 = sphi %s1154_s15, %s1351_s15  }
   0x7   : > { %s1179_s21 = sadd.s32 1, %s1120_s18   ;;  %s102_s22 = sadd.s32 1, %s1116_s17 }
   0x8   : > { %s99_s23 = ssub.s32 %s1120_s18, %s1179_s21  ;;  %p112_p0 = scmp.ne.s32.totalorder %s1116_s17, %s1112_s16 }
   0x9   : > { %p100_p1 = scmp.eq.s32.totalorder %s99_s23, 0  ;;  %p113_p2 = scmp.eq.s32.totalorder %s1175_s19, 1 }
   0xa   : > { %p118_p3 = scmp.ne.s32.totalorder %s1112_s16, %s1108_s15  ;;  %p119_p4 = scmp.eq.s32.totalorder %s750_s20, 1 }
   0xb   : > { %s1190_s24 = scalar_select %p100_p1, %s1116_s17, %s102_s22  }
   0xc   : > { %p1192_p5 = por %p113_p2, %p112_p0  ;;  %p1196_p6 = por %p119_p4, %p118_p3 }
   0xd   : > { %p751_p7 = scmp.ge.s32.totalorder %s1120_s18, 1  ;;  %p152_p8 = scmp.lt.s32.totalorder %s1120_s18, 3 }
   0xe   : > { %p947_p9 = scmp.eq.s32.totalorder %s1175_s19, 0  ;;  %s163_s29 = sshll.u32 %s1346_s2, 4  ;;  %s164_s29 = int_to_ptr.hbm [resolvable:$true] %s163_s29 }
   0xf   : > { %p153_p10 = pnand %p751_p7, %p152_p8  ;;  %s1122_s30 = smov [#allocation2]  }
  0x10   : > { %s165_s5 = sshll.u32 %s1122_s30, 4  ;;  %s1123_s6 = smov 64   ;;  %s166_s5 = int_to_ptr.vmem [resolvable:$true] %s165_s5 }
  0x11   : > { %p936_p11 = pneg %p153_p10  ;;  %s1124_s7 = smov 4  }
  0x12   : > { %199 = sbr.rel (%p153_p10) target bundleno = 576 (0x240), region = 32 }
  0x13   : > { %p937_p12 = pnand %p947_p9, %p936_p11 }
  0x15   : > { %939 = dma.hbm_to_vmem [thread:$0]  (!%p937_p12), %s164_s29, 1024, %s166_s5, [#allocation3], %s1123_s6, %s1123_s6, %s1124_s7  }
  0x17   : > { %1095 = dma.done.wait (%p947_p9), [#allocation3], 1024  }
  0x18   : > { %1097 = vsyncadd (%p947_p9), [#allocation3], 4294966272  ;;  %s758_s8 = sshll.u32 %s1175_s19, 4  ;;  %v1125_v0 = vmov 0   ;;  %v808_v7 = vld [vmem:[#allocation2 + $0x38] sm:$0xff]  ;;  %v807_v18 = vld [vmem:[#allocation2 + $0x30] sm:$0xff] }
  0x19   : > { %990 = vset.pattern.permute.xlu1 %v1125_v0  ;;  %989 = vset.pattern.permute.xlu0 %v1125_v0  ;;  %p237_p13 = scmp.lt.s32.totalorder %s758_s8, 31  ;;  %v806_v19 = vld [vmem:[#allocation2 + $0x28] sm:$0xff]  ;;  %v805_v20 = vld [vmem:[#allocation2 + $0x20] sm:$0xff]  ;;  %v804_v21 = vld [vmem:[#allocation2 + $0x18] sm:$0xff]  ;;  %s1263_s22 = sand.u32 1, %s1112_s16  }
  0x1a   : > { %991 = vset.pattern.permute.xlu2 %v1125_v0  ;;  %449 = vmatpush.bf16.msra.mxu0 %v808_v7  ;;  %v803_v22 = vld [vmem:[#allocation2 + $0x10] sm:$0xff]  ;;  %v802_v23 = vld [vmem:[#allocation2 + $0x8] sm:$0xff]  ;;  %v801_v24 = vld [vmem:[#allocation2] sm:$0xff]  ;;  %s756_s23 = sshll.u32 %s1263_s22, 6  ;;  %s809_s29 = sshll.u32 %s1175_s19, 6 }
  0x1b   : > { %s1356_s8 = smov (!%p237_p13, %s758_s8), 31  ;;  %904 = vmatpush.bf16.msra.mxu1 %v808_v7  ;;  %905 = vmatpush.bf16.msra.mxu2 %v808_v7  ;;  %s1268_s27 = scalar_lea.vmem [#allocation5], %s756_s23 }
  0x1c   : > { %s759_s9 = sshll.u32 %s1356_s8, 3  ;;  %906 = vmatpush.bf16.msra.mxu3 %v808_v7  ;;  %s612_s28 = sshll.u32 %s1268_s27, 4  ;;  %s613_s28 = int_to_ptr.vmem [resolvable:$true] %s612_s28 }
  0x1d   : > { %s1221_s12 = scalar_lea.vmem %s1345_s1, %s759_s9  ;;  %s1244_s20 = scalar_lea.vmem %s1344_s0, %s759_s9 }
  0x1e   : > { %v269_v1 = vld [vmem:[%s1221_s12 + $0x20] sm:$0xff]  ;;  %v267_v3 = vld [vmem:[%s1221_s12 + $0x10] sm:$0xff]  ;;  %v270_v4 = vld [vmem:[%s1221_s12 + $0x28] sm:$0xff]  ;;  %450 = vmatpush.bf16.msra.mxu0 %v807_v18  ;;  %s611_s6 = scalar_lea.hbm %s1347_s3, %s809_s29  ;;  %s595_s8 = scalar_lea.sflag [#allocation4], %s1263_s22 }
  0x1f   : > { %v265_v2 = vld [vmem:[%s1221_s12] sm:$0xff]  ;;  %303 = vperm.xlu1 %990, %v269_v1   ;;  %293 = vperm.xlu2 %991, %v267_v3   ;;  %v266_v5 = vld [vmem:[%s1221_s12 + $0x8] sm:$0xff]  ;;  %v268_v6 = vld [vmem:[%s1221_s12 + $0x18] sm:$0xff]  ;;  %s614_s7 = sshll.u32 %s611_s6, 4  ;;  %s1042_s13 = scalar_lea.hbm %s1347_s3, 128  ;;  %s615_s7 = int_to_ptr.hbm [resolvable:$true] %s614_s7 }
  0x20   : > { %283 = vperm.xlu0 %989, %v265_v2   ;;  %v274_v8 = vld [vmem:[%s1221_s12 + $0x48] sm:$0xff]  ;;  %v273_v9 = vld [vmem:[%s1221_s12 + $0x40] sm:$0xff]  ;;  %v271_v10 = vld [vmem:[%s1221_s12 + $0x30] sm:$0xff]  ;;  %907 = vmatpush.bf16.msra.mxu1 %v807_v18  ;;  %s1036_s9 = sshra.s32 %s615_s7, 4  ;;  %s1037_s9 = int_to_ptr.hbm [resolvable:$true] %s1036_s9 }
  0x21   : > { %v277_v11 = vld [vmem:[%s1221_s12 + $0x60] sm:$0xff]  ;;  %v272_v12 = vld [vmem:[%s1221_s12 + $0x38] sm:$0xff]  ;;  %v278_v13 = vld [vmem:[%s1221_s12 + $0x68] sm:$0xff]  ;;  %908 = vmatpush.bf16.msra.mxu2 %v807_v18  ;;  %909 = vmatpush.bf16.msra.mxu3 %v807_v18  ;;  %s1038_s10 = scalar_lea.hbm %s1037_s9, 64  ;;  %p1043_p3 = scmp.lt.s32.totalorder %s1037_s9, %s1347_s3 }
  0x22   : > { %v276_v14 = vld [vmem:[%s1221_s12 + $0x58] sm:$0xff]  ;;  %v275_v15 = vld [vmem:[%s1221_s12 + $0x50] sm:$0xff]  ;;  %451 = vmatpush.bf16.msra.mxu0 %v806_v19  ;;  %v253_v29 = vld [vmem:[%s1244_s20 + $0x20] sm:$0xff]  ;;  %p1039_p0 = scmp.ne.s32.totalorder %s1037_s9, %s1038_s10  ;;  %p1044_p4 = scmp.lt.s32.totalorder %s1042_s13, %s1038_s10 }
  0x23   : > { %v279_v16 = vld [vmem:[%s1221_s12 + $0x70] sm:$0xff]  ;;  %v280_v17 = vld [vmem:[%s1221_s12 + $0x78] sm:$0xff]  ;;  %v249_v30 = vld [vmem:[%s1244_s20] sm:$0xff] }
  0x24   : > { %910 = vmatpush.bf16.msra.mxu1 %v806_v19  ;;  %v254_v31 = vld [vmem:[%s1244_s20 + $0x28] sm:$0xff]  ;;  %v257_v43 = vld [vmem:[%s1244_s20 + $0x40] sm:$0xff]  ;;  %v251_v49 = vld [vmem:[%s1244_s20 + $0x10] sm:$0xff]  ;;  %p1040_p1 = pnand %p1039_p0, %p1192_p5  ;;  %p1045_p7 = por %p1044_p4, %p1043_p3 }
  0x25   : > { %911 = vmatpush.bf16.msra.mxu2 %v806_v19  ;;  %912 = vmatpush.bf16.msra.mxu3 %v806_v19  ;;  %v250_v32 = vld [vmem:[%s1244_s20 + $0x8] sm:$0xff]  ;;  %v252_v50 = vld [vmem:[%s1244_s20 + $0x18] sm:$0xff]  ;;  %v255_v51 = vld [vmem:[%s1244_s20 + $0x30] sm:$0xff] }
  0x26   : > { %452 = vmatpush.bf16.msra.mxu0 %v805_v20  ;;  %v258_v42 = vld [vmem:[%s1244_s20 + $0x48] sm:$0xff]  ;;  %v261_v53 = vld [vmem:[%s1244_s20 + $0x60] sm:$0xff]  ;;  %v256_v54 = vld [vmem:[%s1244_s20 + $0x38] sm:$0xff]  ;;  %p1041_p2 = pneg %p1040_p1 }
  0x27   : > { %308 = vperm.xlu1 %990, %v270_v4   ;;  %298 = vperm.xlu2 %991, %v268_v6   ;;  %v262_v52 = vld [vmem:[%s1244_s20 + $0x68] sm:$0xff]  ;;  %v260_v3 = vld [vmem:[%s1244_s20 + $0x58] sm:$0xff]  ;;  %v259_v4 = vld [vmem:[%s1244_s20 + $0x50] sm:$0xff] }
  0x28   : > { %288 = vperm.xlu0 %989, %v266_v5   ;;  %913 = vmatpush.bf16.msra.mxu1 %v805_v20  ;;  %p1046_p8 = pnand %p1045_p7, %p1041_p2 }
  0x29   : > { %914 = vmatpush.bf16.msra.mxu2 %v805_v20  ;;  %915 = vmatpush.bf16.msra.mxu3 %v805_v20 }
  0x2a   : > { %453 = vmatpush.bf16.msra.mxu0 %v804_v21 }
  0x2c   : > { %916 = vmatpush.bf16.msra.mxu1 %v804_v21 }
  0x2d   : > { %917 = vmatpush.bf16.msra.mxu2 %v804_v21  ;;  %918 = vmatpush.bf16.msra.mxu3 %v804_v21 }
  0x2e   : > { %454 = vmatpush.bf16.msra.mxu0 %v803_v22 }
  0x2f   : > { %328 = vperm.xlu1 %990, %v274_v8   ;;  %313 = vperm.xlu2 %991, %v271_v10  }
  0x30   : > { %323 = vperm.xlu0 %989, %v273_v9   ;;  %919 = vmatpush.bf16.msra.mxu1 %v803_v22 }
  0x31   : > { %920 = vmatpush.bf16.msra.mxu2 %v803_v22  ;;  %921 = vmatpush.bf16.msra.mxu3 %v803_v22 }
  0x32   : > { %455 = vmatpush.bf16.msra.mxu0 %v802_v23 }
  0x34   : > { %922 = vmatpush.bf16.msra.mxu1 %v802_v23 }
  0x35   : > { %923 = vmatpush.bf16.msra.mxu2 %v802_v23  ;;  %924 = vmatpush.bf16.msra.mxu3 %v802_v23 }
  0x36   : > { %456 = vmatpush.bf16.msra.mxu0 %v801_v24 }
  0x37   : > { %343 = vperm.xlu1 %990, %v277_v11   ;;  %348 = vperm.xlu2 %991, %v278_v13   ;;  %v263_v11 = vld [vmem:[%s1244_s20 + $0x70] sm:$0xff] }
  0x38   : > { %318 = vperm.xlu0 %989, %v272_v12   ;;  %925 = vmatpush.bf16.msra.mxu1 %v801_v24  ;;  %v264_v12 = vld [vmem:[%s1244_s20 + $0x78] sm:$0xff] }
  0x39   : > { %926 = vmatpush.bf16.msra.mxu2 %v801_v24  ;;  %927 = vmatpush.bf16.msra.mxu3 %v801_v24 }
  0x3f   : > { %338 = vperm.xlu1 %990, %v276_v14   ;;  %353 = vperm.xlu2 %991, %v279_v16  }
  0x40   : > { %333 = vperm.xlu0 %989, %v275_v15  }
  0x48   : > { %358 = vperm.xlu0 %989, %v280_v17  }
  0x79   : > { %v294_v25 = vpop.permute.xlu2 %293 }
  0x7a   : > { %v363_v55 = vmul.f32 %v294_v25, %v251_v49 }
  0x81   : > { %v299_v28 = vpop.permute.xlu2 %298 }
  0x82   : > { %v364_v56 = vmul.f32 %v299_v28, %v252_v50 }
  0x84   : > { %v378_v0 = vpack.c.bf16 %v364_v56, %v363_v55 }
  0x89   : > { %v314_v41 = vpop.permute.xlu2 %313 }
  0x8a   : > { %v367_v60 = vmul.f32 %v314_v41, %v255_v51 }
  0x91   : > { %v304_v26 = vpop.permute.xlu1 %303  ;;  %v349_v57 = vpop.permute.xlu2 %348 }
  0x92   : > { %v284_v27 = vpop.permute.xlu0 %283  ;;  %v365_v33 = vmul.f32 %v304_v26, %v253_v29  ;;  %v374_v61 = vmul.f32 %v349_v57, %v262_v52 }
  0x93   : > { %v361_v36 = vmul.f32 %v284_v27, %v249_v30 }
  0x99   : > { %v309_v34 = vpop.permute.xlu1 %308  ;;  %v354_v10 = vpop.permute.xlu2 %353 }
  0x9a   : > { %v289_v35 = vpop.permute.xlu0 %288  ;;  %v366_v37 = vmul.f32 %v309_v34, %v254_v31  ;;  %v375_v14 = vmul.f32 %v354_v10, %v263_v11 }
  0x9b   : > { %v362_v38 = vmul.f32 %v289_v35, %v250_v32 }
  0x9c   : > { %v379_v40 = vpack.c.bf16 %v366_v37, %v365_v33 }
  0x9d   : > { %v377_v39 = vpack.c.bf16 %v362_v38, %v361_v36 }
  0x9e   : > { %467 = vmatmul.bf16.vlgmr.msra.gmra.mxu1 %v379_v40 }
  0x9f   : > { %457 = vmatmul.bf16.vlgmr.msra.gmra.mxu0 %v377_v39 }
  0xa1   : > { %v329_v44 = vpop.permute.xlu1 %328 }
  0xa2   : > { %v324_v45 = vpop.permute.xlu0 %323  ;;  %v370_v46 = vmul.f32 %v329_v44, %v258_v42 }
  0xa3   : > { %v369_v47 = vmul.f32 %v324_v45, %v257_v43 }
  0xa5   : > { %v381_v48 = vpack.c.bf16 %v370_v46, %v369_v47 }
  0xa7   : > { %477 = vmatmul.bf16.vlgmr.msra.gmra.mxu2 %v381_v48 }
  0xa9   : > { %v344_v58 = vpop.permute.xlu1 %343 }
  0xaa   : > { %v319_v59 = vpop.permute.xlu0 %318  ;;  %v373_v62 = vmul.f32 %v344_v58, %v261_v53 }
  0xab   : > { %v368_v63 = vmul.f32 %v319_v59, %v256_v54 }
  0xac   : > { %v383_v2 = vpack.c.bf16 %v374_v61, %v373_v62 }
  0xad   : > { %v380_v1 = vpack.c.bf16 %v368_v63, %v367_v60 }
  0xae   : > { %487 = vmatmul.bf16.vlgmr.msra.gmra.mxu3 %v383_v2 }
  0xaf   : > { %462 = vmatmul.bf16.gmra.mxu0 %v378_v0  ;;  %472 = vmatmul.bf16.gmra.mxu1 %v380_v1 }
  0xb1   : > { %v339_v5 = vpop.permute.xlu1 %338 }
  0xb2   : > { %v334_v6 = vpop.permute.xlu0 %333  ;;  %v372_v7 = vmul.f32 %v339_v5, %v260_v3 }
  0xb3   : > { %v371_v8 = vmul.f32 %v334_v6, %v259_v4 }
  0xb5   : > { %v382_v9 = vpack.c.bf16 %v372_v7, %v371_v8 }
  0xb7   : > { %482 = vmatmul.bf16.gmra.mxu2 %v382_v9 }
  0xba   : > { %v359_v13 = vpop.permute.xlu0 %358 }
  0xbb   : > { %v376_v15 = vmul.f32 %v359_v13, %v264_v12 }
  0xbd   : > { %v384_v16 = vpack.c.bf16 %v376_v15, %v375_v14 }
  0xbf   : > { %492 = vmatmul.bf16.gmra.mxu3 %v384_v16 }
 0x11b   : > { %v468_v18 = vpop.f32.mrf.mxu1 }
 0x11c   : > { %v458_v17 = vpop.f32.mrf.mxu0 }
 0x11d   : > { %530 = vxpose.xlu1.b32.start [1/16] %v458_v17, 128 }
 0x123   : > { %v470_v20 = vpop.f32.mrf.mxu1 }
 0x124   : > { %v460_v19 = vpop.f32.mrf.mxu0  ;;  %v823_v22 = vpack.c.bf16 %v470_v20, %v468_v18 }
 0x125   : > { %v813_v21 = vpack.c.bf16 %v460_v19, %v458_v17  ;;  %531 = vxpose.xlu1.b32.cont [2/16] %v460_v19, 128 }
 0x126   : > { %891 = vst [vmem:[%s1268_s27 + $0x10] sm:$0xff] %v823_v22  }
 0x127   : > { %814 = vst [vmem:[%s1268_s27] sm:$0xff] %v813_v21  }
 0x12a   : > { %v478_v23 = vpop.f32.mrf.mxu2 }
 0x12c   : > { %v463_v24 = vpop.f32.mrf.mxu0  ;;  %v473_v25 = vpop.f32.mrf.mxu1 }
 0x12d   : > { %532 = vxpose.xlu1.b32.cont [3/16] %v463_v24, 128 }
 0x131   : > { %v488_v28 = vpop.f32.mrf.mxu3 }
 0x132   : > { %v480_v26 = vpop.f32.mrf.mxu2 }
 0x133   : > { %v833_v27 = vpack.c.bf16 %v480_v26, %v478_v23 }
 0x134   : > { %v465_v29 = vpop.f32.mrf.mxu0  ;;  %v475_v30 = vpop.f32.mrf.mxu1 }
 0x135   : > { %893 = vst [vmem:[%s1268_s27 + $0x20] sm:$0xff] %v833_v27   ;;  %v818_v31 = vpack.c.bf16 %v465_v29, %v463_v24  ;;  %v828_v32 = vpack.c.bf16 %v475_v30, %v473_v25  ;;  %533 = vxpose.xlu1.b32.cont [4/16] %v465_v29, 128 }
 0x137   : > { %890 = vst [vmem:[%s1268_s27 + $0x8] sm:$0xff] %v818_v31  }
 0x138   : > { %892 = vst [vmem:[%s1268_s27 + $0x18] sm:$0xff] %v828_v32  }
 0x139   : > { %v490_v34 = vpop.f32.mrf.mxu3 }
 0x13a   : > { %v483_v33 = vpop.f32.mrf.mxu2  ;;  %v843_v35 = vpack.c.bf16 %v490_v34, %v488_v28 }
 0x13c   : > { %895 = vst [vmem:[%s1268_s27 + $0x30] sm:$0xff] %v843_v35  }
 0x13d   : > { %534 = vxpose.xlu1.b32.cont [5/16] %v468_v18, 128 }
 0x142   : > { %v485_v36 = vpop.f32.mrf.mxu2  ;;  %v493_v38 = vpop.f32.mrf.mxu3 }
 0x143   : > { %v838_v37 = vpack.c.bf16 %v485_v36, %v483_v33 }
 0x145   : > { %894 = vst [vmem:[%s1268_s27 + $0x28] sm:$0xff] %v838_v37   ;;  %535 = vxpose.xlu1.b32.cont [6/16] %v470_v20, 128 }
 0x14a   : > { %v495_v39 = vpop.f32.mrf.mxu3 }
 0x14b   : > { %v848_v40 = vpack.c.bf16 %v495_v39, %v493_v38 }
 0x14d   : > { %536 = vxpose.xlu1.b32.cont [7/16] %v473_v25, 128  ;;  %896 = vst [vmem:[%s1268_s27 + $0x38] sm:$0xff] %v848_v40  }
 0x155   : > { %537 = vxpose.xlu1.b32.cont [8/16] %v475_v30, 128 }
 0x15d   : > { %538 = vxpose.xlu1.b32.cont [9/16] %v478_v23, 128 }
 0x165   : > { %539 = vxpose.xlu1.b32.cont [10/16] %v480_v26, 128 }
 0x16d   : > { %540 = vxpose.xlu1.b32.cont [11/16] %v483_v33, 128 }
 0x175   : > { %541 = vxpose.xlu1.b32.cont [12/16] %v485_v36, 128 }
 0x17d   : > { %542 = vxpose.xlu1.b32.cont [13/16] %v488_v28, 128 }
 0x185   : > { %543 = vxpose.xlu1.b32.cont [14/16] %v490_v34, 128 }
 0x18d   : > { %544 = vxpose.xlu1.b32.cont [15/16] %v493_v38, 128 }
 0x195   : > { %545 = vxpose.xlu1.b32.end [16/16] %v495_v39, 128 }
 0x196   : > { %1049 = shalt.err (!%p1046_p8)
}
 0x197   : > { %s1126_s27 = smov 64   ;;  %s1127_s29 = smov 4  }
 0x198   : > { %932 = dma.vmem_to_hbm [thread:$0]  (%p1192_p5), %s613_s28, 1024, %s615_s7, %s595_s8, %s1126_s27, %s1126_s27, %s1127_s29  }
 0x199   : > { %s1299_s30 = scalar_lea.vmem [#allocation6], %s756_s23  ;;  %s798_s23 = sshll.u32 %s1175_s19, 2 }
 0x19a   : > { %s627_s6 = scalar_lea.hbm %s1348_s4, %s798_s23  ;;  %s628_s7 = sshll.u32 %s1299_s30, 4  ;;  %s629_s7 = int_to_ptr.vmem [resolvable:$true] %s628_s7 }
 0x19b   : > { %s630_s8 = sshll.u32 %s627_s6, 4  ;;  %s600_s9 = scalar_lea.sflag [#allocation7], %s1263_s22  ;;  %s631_s8 = int_to_ptr.hbm [resolvable:$true] %s630_s8 }
 0x19c   : > { %s1064_s10 = sshra.s32 %s631_s8, 4  ;;  %s1070_s13 = scalar_lea.hbm %s1348_s4, 128  ;;  %s1065_s10 = int_to_ptr.hbm [resolvable:$true] %s1064_s10 }
 0x19d   : > { %s1066_s11 = scalar_lea.hbm %s1065_s10, 64  ;;  %p1071_p12 = scmp.lt.s32.totalorder %s1065_s10, %s1348_s4 }
 0x19e   : > { %p1067_p9 = scmp.ne.s32.totalorder %s1065_s10, %s1066_s11  ;;  %p1072_p13 = scmp.lt.s32.totalorder %s1070_s13, %s1066_s11 }
 0x1a0   : > { %p1068_p10 = pnand %p1067_p9, %p1192_p5  ;;  %p1073_p0 = por %p1072_p13, %p1071_p12 }
 0x1a2   : > { %p1069_p11 = pneg %p1068_p10 }
 0x1a4   : > { %p1074_p1 = pnand %p1073_p0, %p1069_p11 }
 0x1c1   : > { %v546_v41 = vpop.trf.xlu1 }
 0x1c9   : > { %v547_v42 = vpop.trf.xlu1 }
 0x1ca   : > { %v853_v43 = vpack.c.bf16 %v547_v42, %v546_v41 }
 0x1cc   : > { %854 = vst [vmem:[%s1299_s30] sm:$0xff] %v853_v43  }
 0x1d1   : > { %v548_v44 = vpop.trf.xlu1 }
 0x1d9   : > { %v549_v45 = vpop.trf.xlu1 }
 0x1da   : > { %v858_v46 = vpack.c.bf16 %v549_v45, %v548_v44 }
 0x1dc   : > { %897 = vst [vmem:[%s1299_s30 + $0x8] sm:$0xff] %v858_v46  }
 0x1e1   : > { %v550_v47 = vpop.trf.xlu1 }
 0x1e9   : > { %v551_v48 = vpop.trf.xlu1 }
 0x1ea   : > { %v863_v49 = vpack.c.bf16 %v551_v48, %v550_v47 }
 0x1ec   : > { %898 = vst [vmem:[%s1299_s30 + $0x10] sm:$0xff] %v863_v49  }
 0x1f1   : > { %v552_v50 = vpop.trf.xlu1 }
 0x1f9   : > { %v553_v51 = vpop.trf.xlu1 }
 0x1fa   : > { %v868_v52 = vpack.c.bf16 %v553_v51, %v552_v50 }
 0x1fc   : > { %899 = vst [vmem:[%s1299_s30 + $0x18] sm:$0xff] %v868_v52  }
 0x201   : > { %v554_v53 = vpop.trf.xlu1 }
 0x209   : > { %v555_v54 = vpop.trf.xlu1 }
 0x20a   : > { %v873_v55 = vpack.c.bf16 %v555_v54, %v554_v53 }
 0x20c   : > { %900 = vst [vmem:[%s1299_s30 + $0x20] sm:$0xff] %v873_v55  }
 0x211   : > { %v556_v56 = vpop.trf.xlu1 }
 0x219   : > { %v557_v57 = vpop.trf.xlu1 }
 0x21a   : > { %v878_v58 = vpack.c.bf16 %v557_v57, %v556_v56 }
 0x21c   : > { %901 = vst [vmem:[%s1299_s30 + $0x28] sm:$0xff] %v878_v58  }
 0x221   : > { %v558_v59 = vpop.trf.xlu1 }
 0x229   : > { %v559_v60 = vpop.trf.xlu1 }
 0x22a   : > { %v883_v61 = vpack.c.bf16 %v559_v60, %v558_v59 }
 0x22c   : > { %902 = vst [vmem:[%s1299_s30 + $0x30] sm:$0xff] %v883_v61  }
 0x231   : > { %v560_v62 = vpop.trf.xlu1 }
 0x239   : > { %v561_v63 = vpop.trf.xlu1 }
 0x23a   : > { %v888_v0 = vpack.c.bf16 %v561_v63, %v560_v62 }
 0x23c   : > { %903 = vst [vmem:[%s1299_s30 + $0x38] sm:$0xff] %v888_v0  }
 0x23d   : > { %1077 = shalt.err (!%p1074_p1)
}
 0x23e   : > { %s1128_s22 = smov 128  }
 0x23f   : > { %933 = dma.vmem_to_hbm [thread:$0]  (%p1192_p5), %s629_s7, 1024, %s631_s8, %s600_s9, %s1126_s27, %s1128_s22, %s1127_s29  }
 0x240 PF: > { %p949_p2 = scmp.ge.s32.totalorder %s1120_s18, 2  ;;  %s645_s30 = sand.u32 1, %s1108_s15  }
 0x241   : > { %s646_s23 = scalar_lea.sflag [#allocation4], %s645_s30 }
 0x242   : > { %p941_p3 = pnand %p949_p2, %p1196_p6 }
 0x244   : > { %p942_p4 = pneg %p941_p3 }
 0x246   : > { %1099 = dma.done.wait (%p942_p4), %s646_s23, 1024  }
 0x247   : > { %1101 = vsyncadd (%p942_p4), %s646_s23, 4294966272  ;;  %s656_s28 = scalar_lea.sflag [#allocation7], %s645_s30 }
 0x248   : > { %1103 = dma.done.wait (%p942_p4), %s656_s28, 1024  }
 0x249   : > { %1105 = vsyncadd (%p942_p4), %s656_s28, 4294966272  ;;  %p19_p5 = scmp.ge.s32.totalorder %s1179_s21, 4   ;;  %s1351_s15 = smov %s1112_s16 }
 0x24a   : > { %s1352_s16 = smov %s1116_s17  ;;  %s1353_s17 = smov %s1190_s24 }
 0x24b   : > { %s1354_s18 = smov %s1179_s21  ;;  %21 = sbr.rel (!%p19_p5) target bundleno = 6 (0x6), region = 92 }
 0x250   :  { %662 = vsyncpa [#allocation3], 1 }
 0x251   :  { %664 = vsyncpa [#allocation3 + $0x1], 1 }
 0x252   :  { %665 = vsyncpa [#allocation4], 1 }
 0x253   :  { %667 = vsyncpa [#allocation4 + $0x1], 1 }
 0x254   :  { %668 = vsyncpa [#allocation7], 1 }
 0x255   :  { %670 = vsyncpa [#allocation7 + $0x1], 1 }

</bundles_post_ra>
